<compile_context>
chip_gen: v5e
topology: v5e:2x2
jax: 0.10.0
libtpu: 0.0.40
codegen_flags: <defaults>
</compile_context>

<pallas_src>
import math

import jax
import jax.numpy as jnp
from jax.experimental import pallas as pl
from jax.experimental.pallas import tpu as pltpu

LANE = 128          # TPU lane width
HALF = LANE // 2    # packing boundary: action lanes [0:64), log_prob lanes [64:128)


def _round_up(n, m):
    return ((n + m - 1) // m) * m


def _batch_tiling(B, cap=2048):
    """Pick (TB, B_pad).

    - pad the batch only to a multiple of 8 whenever possible (avoids the old
      round-up-to-TB blowup, e.g. B=520 -> 1024),
    - keep >= 2 grid steps for batches >= 128 rows (v7x has 2 TensorCores),
    - cap TB at 2048 rows so the double-buffered VMEM footprint stays small on all gens.
    """
    b8 = _round_up(B, 8)
    if b8 <= 2 * cap:
        if b8 >= 128 and (b8 // 2) % 8 == 0:
            return b8 // 2, b8          # two equal tiles, zero extra padding
        return b8, b8                   # single tile (small batches)
    # very large batches: even split into ceil(b8/cap) tiles; waste < 8 rows per tile
    ntiles = -(-b8 // cap)
    tb = _round_up(-(-b8 // ntiles), 8)
    return tb, tb * ntiles


def make_policy_kernel(action_bound, hid_pad, bug_compat_double_tanh=True):
    neg_half_log_2pi = -0.5 * math.log(2.0 * math.pi)

    def policy_kernel(xe_ref, w1e_ref, b1e_ref, wh_ref, bh_ref, out_ref):
        xe = xe_ref[...]                                        # (TB, obs_dim + act_dim)

        # Fused first layer: output lanes [0:hid_pad) are fc1, lanes [hid_pad:hid_pad+128)
        # are an identity routing of the eps inputs (zero rows/cols elsewhere), so eps
        # lands lane-dense and exactly zero-padded — no narrow-lane ops anywhere.
        pre = jnp.dot(xe, w1e_ref[...], preferred_element_type=jnp.float32,
                      precision=jax.lax.Precision.HIGHEST) + b1e_ref[...]
        h = jnp.maximum(pre[:, :hid_pad], 0.0)                  # relu(fc1(x))
        eps = pre[:, hid_pad:]                                  # (TB, 128); lanes >= act_dim == 0

        # Fused mu/std heads: one matmul, lanes [0:128) = mu, [128:256) = pre_std.
        head = jnp.dot(h, wh_ref[...], preferred_element_type=jnp.float32,
                       precision=jax.lax.Precision.HIGHEST) + bh_ref[...]
        mu = head[:, :LANE]
        pre_std = head[:, LANE:]

        # Stable softplus using only exp/log/max (avoids log1p lowering).
        m = jnp.maximum(pre_std, 0.0)
        std = m + jnp.log(jnp.exp(pre_std - m) + jnp.exp(-m))
        # Guard log(std) against softplus underflow (torch would produce +/-inf here).
        std = jnp.maximum(std, 1e-37)

        # Reparameterized sample; (z - mu)/std == eps exactly by construction, so
        # Normal(mu, std).log_prob(z) needs no division.
        z = mu + std * eps
        log_prob = -0.5 * (eps * eps) - jnp.log(std) + neg_half_log_2pi

        action = jnp.tanh(z)
        t = jnp.tanh(action) if bug_compat_double_tanh else action   # torch uses tanh(tanh(z))
        log_prob = log_prob - jnp.log(1.0 - t * t + 1e-07)

        # Pack both results into one slab: action*bound in lanes [0:64), log_prob shifted
        # into lanes [64:128) with an XLU roll -> single full unmasked 128-lane store.
        lane = jax.lax.broadcasted_iota(jnp.int32, action.shape, 1)
        packed = jnp.where(lane < HALF,
                           action * action_bound,
                           pltpu.roll(log_prob, shift=HALF, axis=1))
        out_ref[...] = packed

    return policy_kernel


def prepare_params(params, obs_dim, hidden_dim, act_dim):
    """Fuse / pad weights ONCE (hoisted out of the per-call forward).

    Returns (w1e, b1e, wh, bh, dims):
      w1e: (obs_dim+act_dim, hid_pad+128)   fc1 columns + eps identity-routing columns
      b1e: (1, hid_pad+128)
      wh : (hid_pad, 256)                   mu head lanes [0:128), std head lanes [128:256)
      bh : (1, 256)
    Zero padding is benign: pad lanes stay finite and are sliced off in the wrapper.
    """
    assert act_dim <= HALF, "output packing assumes act_dim <= 64"
    w1, b1, wmu, bmu, wstd, bstd = params
    hid_pad = _round_up(hidden_dim, LANE)
    in_dim = obs_dim + act_dim

    w1e = jnp.zeros((in_dim, hid_pad + LANE), jnp.float32)
    w1e = w1e.at[:obs_dim, :hidden_dim].set(w1)
    w1e = w1e.at[obs_dim + jnp.arange(act_dim), hid_pad + jnp.arange(act_dim)].set(1.0)
    b1e = jnp.zeros((1, hid_pad + LANE), jnp.float32).at[:, :hidden_dim].set(b1)

    wh = jnp.zeros((hid_pad, 2 * LANE), jnp.float32)
    wh = wh.at[:hidden_dim, :act_dim].set(wmu)
    wh = wh.at[:hidden_dim, LANE:LANE + act_dim].set(wstd)
    bh = jnp.zeros((1, 2 * LANE), jnp.float32)
    bh = bh.at[:, :act_dim].set(bmu)
    bh = bh.at[:, LANE:LANE + act_dim].set(bstd)

    dims = (obs_dim, hidden_dim, act_dim, hid_pad)
    return w1e, b1e, wh, bh, dims


def policy_net_continuous_forward(x, eps, fused, action_bound,
                                  bug_compat_double_tanh=True):
    """Stochastic forward. x: (B, obs_dim), eps: (B, act_dim) ~ N(0,1) noise for rsample.
    Returns (action, log_prob), each (B, act_dim).
    (In a training loop, wrap the whole step in jax.jit so this traces once per shape.)
    """
    w1e, b1e, wh, bh, (obs_dim, hidden_dim, act_dim, hid_pad) = fused
    B = x.shape[0]
    in_dim = obs_dim + act_dim

    TB, B_pad = _batch_tiling(B)
    # x and eps carried at real width in one stream; only the batch axis is padded (to 8s).
    xe = jnp.zeros((B_pad, in_dim), jnp.float32)
    xe = xe.at[:B, :obs_dim].set(x).at[:B, obs_dim:].set(eps)

    kernel = make_policy_kernel(float(action_bound), hid_pad, bug_compat_double_tanh)

    packed = pl.pallas_call(
        kernel,
        out_shape=jax.ShapeDtypeStruct((B_pad, LANE), jnp.float32),
        grid=(B_pad // TB,),
        in_specs=[
            pl.BlockSpec((TB, in_dim), lambda i: (i, 0)),              # x|eps, tiled over batch
            pl.BlockSpec((in_dim, hid_pad + LANE), lambda i: (0, 0)),  # fused fc1 (+eps routing)
            pl.BlockSpec((1, hid_pad + LANE), lambda i: (0, 0)),       # fused fc1 bias
            pl.BlockSpec((hid_pad, 2 * LANE), lambda i: (0, 0)),       # fused mu/std head weight
            pl.BlockSpec((1, 2 * LANE), lambda i: (0, 0)),             # fused mu/std head bias
        ],
        out_specs=pl.BlockSpec((TB, LANE), lambda i: (i, 0)),          # packed action|log_prob
        compiler_params=pltpu.CompilerParams(
            dimension_semantics=("parallel",),
            # TB<=2048 -> ~2.5 MB double-buffered VMEM: fits default scoped budget on
            # v5e (16 MiB) / v6e / v7x; set vmem_limit_bytes here if TB is raised further.
        ),
    )(xe, w1e, b1e, wh, bh)

    action = packed[:B, :act_dim]
    log_prob = packed[:B, HALF:HALF + act_dim]
    return action, log_prob


def init_params(key, obs_dim, hidden_dim, act_dim):
    """Deterministic PyTorch-Linear-style init: U(-1/sqrt(fan_in), 1/sqrt(fan_in))."""
    ks = jax.random.split(key, 6)

    def linear(kw, kb, fan_in, fan_out):
        bound = 1.0 / math.sqrt(fan_in)
        w = jax.random.uniform(kw, (fan_in, fan_out), jnp.float32, -bound, bound)
        b = jax.random.uniform(kb, (1, fan_out), jnp.float32, -bound, bound)
        return w, b

    w1, b1 = linear(ks[0], ks[1], obs_dim, hidden_dim)
    wmu, bmu = linear(ks[2], ks[3], hidden_dim, act_dim)
    wstd, bstd = linear(ks[4], ks[5], hidden_dim, act_dim)
    return (w1, b1, wmu, bmu, wstd, bstd)


if __name__ == "__main__":
    # Match kernel/reference matmul precision so the exactness check is meaningful.
    jax.config.update("jax_default_matmul_precision", "highest")

    OBS_DIM, HIDDEN, ACT_DIM, ACTION_BOUND = 16, 32, 4, 2.0

    key = jax.random.PRNGKey(0)
    k_params, k_x, k_eps = jax.random.split(key, 3)
    params = init_params(k_params, OBS_DIM, HIDDEN, ACT_DIM)
    # Hoisted: fuse/pad weights once (per review), not inside every forward call.
    fused = prepare_params(params, OBS_DIM, HIDDEN, ACT_DIM)

    def reference(x, eps):
        w1, b1, wmu, bmu, wstd, bstd = params
        h = jnp.maximum(x @ w1 + b1, 0.0)
        mu = h @ wmu + bmu
        std = jax.nn.softplus(h @ wstd + bstd)
        z = mu + std * eps
        lp = -0.5 * ((z - mu) / std) ** 2 - jnp.log(std) - 0.5 * math.log(2.0 * math.pi)
        act = jnp.tanh(z)
        lp = lp - jnp.log(1.0 - jnp.tanh(act) ** 2 + 1e-07)
        return act * ACTION_BOUND, lp

    # B=8 exercises the single-tile path; B=256 exercises the 2-step grid path
    # (128-row tiles, padding lanes, "parallel" semantics).
    for B in (8, 256):
        kx = jax.random.fold_in(k_x, B)
        ke = jax.random.fold_in(k_eps, B)
        x = jax.random.normal(kx, (B, OBS_DIM), dtype=jnp.float32)
        eps = jax.random.normal(ke, (B, ACT_DIM), dtype=jnp.float32)   # N(0,1) for rsample

        action, log_prob = policy_net_continuous_forward(x, eps, fused, ACTION_BOUND)
        jax.block_until_ready((action, log_prob))

        ref_act, ref_lp = reference(x, eps)
        assert action.shape == (B, ACT_DIM) and log_prob.shape == (B, ACT_DIM)
        assert jnp.allclose(action, ref_act, atol=1e-5, rtol=1e-5), "action mismatch"
        assert jnp.allclose(log_prob, ref_lp, atol=1e-4, rtol=1e-4), "log_prob mismatch"

    print("KERNEL_OK")
</pallas_src>

<mosaic_0001>
module attributes {stable_mosaic.version = 11 : i64} {
  func.func @policy_kernel(%arg0: i32, %arg1: memref<8x20xf32, #tpu.memory_space<vmem>>, %arg2: memref<20x256xf32, #tpu.memory_space<vmem>>, %arg3: memref<1x256xf32, #tpu.memory_space<vmem>>, %arg4: memref<128x256xf32, #tpu.memory_space<vmem>>, %arg5: memref<1x256xf32, #tpu.memory_space<vmem>>, %arg6: memref<8x128xf32, #tpu.memory_space<vmem>>) attributes {dimension_semantics = [#tpu.dimension_semantics<parallel>], iteration_bounds = array<i64: 1>, scalar_prefetch = 0 : i64, scratch_operands = 0 : i64, tpu.core_type = #tpu.core_type<tc>, window_params = [{transform_indices = @transform_0, window_bounds = array<i64: 8, 20>}, {pipeline_mode = #tpu.pipeline_mode<synchronous>, transform_indices = @transform_1, window_bounds = array<i64: 20, 256>}, {pipeline_mode = #tpu.pipeline_mode<synchronous>, transform_indices = @transform_2, window_bounds = array<i64: 1, 256>}, {pipeline_mode = #tpu.pipeline_mode<synchronous>, transform_indices = @transform_3, window_bounds = array<i64: 128, 256>}, {pipeline_mode = #tpu.pipeline_mode<synchronous>, transform_indices = @transform_4, window_bounds = array<i64: 1, 256>}, {transform_indices = @transform_5, window_bounds = array<i64: 8, 128>}]} {
    %c0 = arith.constant 0 : index
    %c0_0 = arith.constant 0 : index
    %0 = vector.load %arg1[%c0, %c0_0] : memref<8x20xf32, #tpu.memory_space<vmem>>, vector<8x20xf32>
    %c0_1 = arith.constant 0 : index
    %c0_2 = arith.constant 0 : index
    %1 = vector.load %arg2[%c0_1, %c0_2] : memref<20x256xf32, #tpu.memory_space<vmem>>, vector<20x256xf32>
    %cst = arith.constant dense<0.000000e+00> : vector<8x256xf32>
    %2 = tpu.matmul %0, %1, %cst {dimension_numbers = #tpu.dot_dimension_numbers<[1], [0], [0], [1], [0, 0, 1, 1], [], []>, precision = #tpu.contract_precision<fp32>} : vector<8x20xf32>, vector<20x256xf32>, vector<8x256xf32> -> vector<8x256xf32>
    %c0_3 = arith.constant 0 : index
    %c0_4 = arith.constant 0 : index
    %3 = vector.load %arg3[%c0_3, %c0_4] : memref<1x256xf32, #tpu.memory_space<vmem>>, vector<1x256xf32>
    %4 = vector.broadcast %3 : vector<1x256xf32> to vector<8x256xf32>
    %5 = arith.addf %2, %4 : vector<8x256xf32>
    %6 = vector.extract_strided_slice %5 {offsets = [0, 0], sizes = [8, 128], strides = [1, 1]} : vector<8x256xf32> to vector<8x128xf32>
    %cst_5 = arith.constant 0.000000e+00 : f32
    %7 = vector.broadcast %cst_5 : f32 to vector<8x128xf32>
    %8 = arith.maximumf %6, %7 : vector<8x128xf32>
    %9 = vector.extract_strided_slice %5 {offsets = [0, 128], sizes = [8, 128], strides = [1, 1]} : vector<8x256xf32> to vector<8x128xf32>
    %c0_6 = arith.constant 0 : index
    %c0_7 = arith.constant 0 : index
    %10 = vector.load %arg4[%c0_6, %c0_7] : memref<128x256xf32, #tpu.memory_space<vmem>>, vector<128x256xf32>
    %cst_8 = arith.constant dense<0.000000e+00> : vector<8x256xf32>
    %11 = tpu.matmul %8, %10, %cst_8 {dimension_numbers = #tpu.dot_dimension_numbers<[1], [0], [0], [1], [0, 0, 1, 1], [], []>, precision = #tpu.contract_precision<fp32>} : vector<8x128xf32>, vector<128x256xf32>, vector<8x256xf32> -> vector<8x256xf32>
    %c0_9 = arith.constant 0 : index
    %c0_10 = arith.constant 0 : index
    %12 = vector.load %arg5[%c0_9, %c0_10] : memref<1x256xf32, #tpu.memory_space<vmem>>, vector<1x256xf32>
    %13 = vector.broadcast %12 : vector<1x256xf32> to vector<8x256xf32>
    %14 = arith.addf %11, %13 : vector<8x256xf32>
    %15 = vector.extract_strided_slice %14 {offsets = [0, 0], sizes = [8, 128], strides = [1, 1]} : vector<8x256xf32> to vector<8x128xf32>
    %16 = vector.extract_strided_slice %14 {offsets = [0, 128], sizes = [8, 128], strides = [1, 1]} : vector<8x256xf32> to vector<8x128xf32>
    %cst_11 = arith.constant 0.000000e+00 : f32
    %17 = vector.broadcast %cst_11 : f32 to vector<8x128xf32>
    %18 = arith.maximumf %16, %17 : vector<8x128xf32>
    %19 = arith.subf %16, %18 : vector<8x128xf32>
    %20 = math.exp %19 : vector<8x128xf32>
    %cst_12 = arith.constant 0.000000e+00 : f32
    %21 = vector.broadcast %cst_12 : f32 to vector<8x128xf32>
    %22 = arith.subf %21, %18 : vector<8x128xf32>
    %23 = math.exp %22 : vector<8x128xf32>
    %24 = arith.addf %20, %23 : vector<8x128xf32>
    %25 = math.log %24 : vector<8x128xf32>
    %26 = arith.addf %18, %25 : vector<8x128xf32>
    %cst_13 = arith.constant 9.99999991E-38 : f32
    %27 = vector.broadcast %cst_13 : f32 to vector<8x128xf32>
    %28 = arith.maximumf %26, %27 : vector<8x128xf32>
    %29 = arith.mulf %28, %9 : vector<8x128xf32>
    %30 = arith.addf %15, %29 : vector<8x128xf32>
    %31 = arith.mulf %9, %9 : vector<8x128xf32>
    %cst_14 = arith.constant -5.000000e-01 : f32
    %32 = vector.broadcast %cst_14 : f32 to vector<8x128xf32>
    %33 = arith.mulf %32, %31 : vector<8x128xf32>
    %34 = math.log %28 : vector<8x128xf32>
    %35 = arith.subf %33, %34 : vector<8x128xf32>
    %cst_15 = arith.constant -0.918938517 : f32
    %36 = vector.broadcast %cst_15 : f32 to vector<8x128xf32>
    %37 = arith.addf %35, %36 : vector<8x128xf32>
    %38 = math.tanh %30 : vector<8x128xf32>
    %39 = math.tanh %38 : vector<8x128xf32>
    %40 = arith.mulf %39, %39 : vector<8x128xf32>
    %cst_16 = arith.constant 1.000000e+00 : f32
    %41 = vector.broadcast %cst_16 : f32 to vector<8x128xf32>
    %42 = arith.subf %41, %40 : vector<8x128xf32>
    %cst_17 = arith.constant 1.000000e-07 : f32
    %43 = vector.broadcast %cst_17 : f32 to vector<8x128xf32>
    %44 = arith.addf %42, %43 : vector<8x128xf32>
    %45 = math.log %44 : vector<8x128xf32>
    %46 = arith.subf %37, %45 : vector<8x128xf32>
    %47 = tpu.iota {dimensions = array<i32: 1>} : vector<8x128xi32>
    %c64_i32 = arith.constant 64 : i32
    %48 = vector.broadcast %c64_i32 : i32 to vector<8x128xi32>
    %49 = arith.cmpi slt, %47, %48 : vector<8x128xi32>
    %cst_18 = arith.constant 2.000000e+00 : f32
    %50 = vector.broadcast %cst_18 : f32 to vector<8x128xf32>
    %51 = arith.mulf %38, %50 : vector<8x128xf32>
    %c64_i32_19 = arith.constant 64 : i32
    %52 = tpu.dynamic_rotate %46 by %c64_i32_19 dim 1 : vector<8x128xf32>, i32 -> vector<8x128xf32>
    %53 = arith.select %49, %51, %52 : vector<8x128xi1>, vector<8x128xf32>
    %c0_20 = arith.constant 0 : index
    %c0_21 = arith.constant 0 : index
    %54 = vector.load %arg6[%c0_20, %c0_21] : memref<8x128xf32, #tpu.memory_space<vmem>>, vector<8x128xf32>
    tpu.vector_store %arg6[%c0_20, %c0_21], %53 {strides = array<i32>} : memref<8x128xf32, #tpu.memory_space<vmem>>, vector<8x128xf32>,
    return
  }
  func.func @transform_0(%arg0: i32) -> (i32, i32) {
    %c0_i32 = arith.constant 0 : i32
    %c0_i32_0 = arith.constant 0 : i32
    return %arg0, %c0_i32 : i32, i32
  }
  func.func @transform_1(%arg0: i32) -> (i32, i32) {
    %c0_i32 = arith.constant 0 : i32
    %c0_i32_0 = arith.constant 0 : i32
    %c0_i32_1 = arith.constant 0 : i32
    return %c0_i32, %c0_i32_0 : i32, i32
  }
  func.func @transform_2(%arg0: i32) -> (i32, i32) {
    %c0_i32 = arith.constant 0 : i32
    %c0_i32_0 = arith.constant 0 : i32
    %c0_i32_1 = arith.constant 0 : i32
    return %c0_i32, %c0_i32_0 : i32, i32
  }
  func.func @transform_3(%arg0: i32) -> (i32, i32) {
    %c0_i32 = arith.constant 0 : i32
    %c0_i32_0 = arith.constant 0 : i32
    %c0_i32_1 = arith.constant 0 : i32
    return %c0_i32, %c0_i32_0 : i32, i32
  }
  func.func @transform_4(%arg0: i32) -> (i32, i32) {
    %c0_i32 = arith.constant 0 : i32
    %c0_i32_0 = arith.constant 0 : i32
    %c0_i32_1 = arith.constant 0 : i32
    return %c0_i32, %c0_i32_0 : i32, i32
  }
  func.func @transform_5(%arg0: i32) -> (i32, i32) {
    %c0_i32 = arith.constant 0 : i32
    %c0_i32_0 = arith.constant 0 : i32
    return %arg0, %c0_i32 : i32, i32
  }
}

</mosaic_0001>

<bundles_post_ra>
// kernel: tpu_custom_call.1
= control target key start
LH: loop header
LB: loop body
LE: loop exit
PB: predicated region body
PF: predicated region fallthrough
CT: control target
= control target key end

     0   :  { %10 = vsyncpa [#allocation3], 0  ;;  %s2009_s0 = inlined_call_operand.hbm [shape: f32[8,20], index: 0, kind: input, shape index: {}]   ;;  %s2010_s1 = inlined_call_operand.hbm [shape: f32[20,256], index: 1, kind: input, shape index: {}]   ;;  %s2011_s2 = inlined_call_operand.hbm [shape: f32[1,256], index: 2, kind: input, shape index: {}]   ;;  %s2012_s3 = inlined_call_operand.hbm [shape: f32[128,256], index: 3, kind: input, shape index: {}]   ;;  %s2013_s4 = inlined_call_operand.vmem [shape: f32[1,256], index: 4, kind: input, shape index: {}]   ;;  %s2014_s5 = inlined_call_operand.hbm [shape: f32[8,128], index: 5, kind: output, shape index: {}]  }
   0x1   :  { %11 = vsyncpa [#allocation6], 0 }
   0x2   :  { %12 = vsyncpa [#allocation9], 0  ;;  %s29_s20 = sshll.u32 %s2010_s1, 4  ;;  %s30_s20 = int_to_ptr.hbm [resolvable:$true] %s29_s20 }
   0x3   :  { %13 = vsyncpa [#allocation4], 0  ;;  %s1374_s21 = smov [#allocation5]   ;;  %s19_s25 = sshll.u32 %s2009_s0, 4  ;;  %s20_s25 = int_to_ptr.hbm [resolvable:$true] %s19_s25 }
   0x4   :  { %s31_s22 = sshll.u32 %s1374_s21, 4  ;;  %s1375_s26 = smov 256   ;;  %s32_s22 = int_to_ptr.vmem [resolvable:$true] %s31_s22 }
   0x5   :  { %s1376_s27 = smov 16   ;;  %s1377_s28 = smov [#allocation2]  }
   0x6   :  { %37 = dma.hbm_to_vmem [thread:$0]  %s30_s20, 768, %s32_s22, [#allocation6], %s1375_s26, %s1375_s26, %s1376_s27  }
   0x7   :  { %s21_s29 = sshll.u32 %s1377_s28, 4  ;;  %s43_s7 = sshll.u32 %s2011_s2, 4  ;;  %s22_s29 = int_to_ptr.vmem [resolvable:$true] %s21_s29  ;;  %s44_s7 = int_to_ptr.hbm [resolvable:$true] %s43_s7 }
   0x8   :  { %24 = dma.hbm_to_vmem [thread:$0]  %s20_s25, 128, %s22_s29, [#allocation3]  }
   0x9   :  { %s53_s9 = sshll.u32 %s2012_s3, 4  ;;  %s1378_s10 = smov [#allocation7]   ;;  %s54_s9 = int_to_ptr.hbm [resolvable:$true] %s53_s9 }
   0xa   :  { %s45_s11 = sshll.u32 %s1378_s10, 4  ;;  %s1379_s0 = smov [#allocation8]   ;;  %s46_s11 = int_to_ptr.vmem [resolvable:$true] %s45_s11 }
   0xb   :  { %48 = dma.hbm_to_vmem [thread:$0]  %s44_s7, 32, %s46_s11, [#allocation6]  }
   0xc   :  { %s55_s12 = sshll.u32 %s1379_s0, 4  ;;  %s56_s12 = int_to_ptr.vmem [resolvable:$true] %s55_s12 }
   0xd   :  { %61 = dma.hbm_to_vmem [thread:$0]  %s54_s9, 4096, %s56_s12, [#allocation9], %s1375_s26, %s1375_s26, %s1376_s27  }
   0xe   :  { %1366 = dma.done.wait [#allocation3], 128  }
   0xf   :  { %1367 = vsyncadd [#allocation3], 4294967168 }
  0x10   :  { %1368 = dma.done.wait [#allocation6], 800  }
  0x11   :  { %1369 = vsyncadd [#allocation6], 4294966496 }
  0x12   :  { %1370 = dma.done.wait [#allocation9], 4096  }
  0x13   :  { %1371 = vsyncadd [#allocation9], 4294963200  ;;  %vm97_vm0 = vcmask 1043456   ;;  %vm93_vm1 = vcmask 162816   ;;  %v85_v0 = vld [vmem:[#allocation5 + $0x20] sm:$0xf] }
  0x14   :  { %v86_v1 = vld [vmem:[#allocation5 + $0x28] sm:$0xf]  ;;  %v83_v2 = vld [vmem:[#allocation5 + $0x10] sm:$0xff]  ;;  %v99_v3 = vsel %vm97_vm0, %v85_v0, 0  ;;  %v81_v6 = vld [vmem:[#allocation5] sm:$0xff]  ;;  %s1381_s13 = smov [#allocation10]  }
  0x15   :  { %v102_v4 = vsel %vm97_vm0, %v86_v1, 0  ;;  %v1424_v5 = vand.u32 4294901760, %v83_v2  ;;  %v80_v7 = vld [vmem:[#allocation2] sm:$0xff]  ;;  %v1426_v9 = vand.u32 4294901760, %v99_v3  ;;  %v1428_v10 = vand.u32 4294901760, %v81_v6  ;;  %v82_v13 = vld [vmem:[#allocation5 + $0x8] sm:$0xff] }
  0x16   :  { %v84_v8 = vld [vmem:[#allocation5 + $0x18] sm:$0xff]  ;;  %v95_v11 = vsel %vm93_vm1, %v80_v7, 0  ;;  %v1430_v12 = vand.u32 4294901760, %v102_v4  ;;  %v1437_v17 = vand.u32 4294901760, %v82_v13  ;;  %v479_v28 = vld [vmem:[#allocation8 + $0xf0] sm:$0xff]  ;;  %s1210_s14 = sshll.u32 %s1381_s13, 4  ;;  %s1211_s14 = int_to_ptr.vmem [resolvable:$true] %s1210_s14 }
  0x17   :  { %v152_v14 = vsub.f32 %v83_v2, %v1424_v5  ;;  %v1433_v15 = vand.u32 4294901760, %v95_v11  ;;  %v1435_v16 = vand.u32 4294901760, %v84_v8  ;;  %v146_v18 = vsub.f32 %v99_v3, %v1426_v9  ;;  %118 = vmatpush.msra.mxu0 %v1426_v9  ;;  %210 = vmatpush.msra.mxu3 %v1426_v9  ;;  %v477_v36 = vld [vmem:[#allocation8 + $0xe0] sm:$0xff]  ;;  %v475_v43 = vld [vmem:[#allocation8 + $0xd0] sm:$0xff]  ;;  %s1212_s17 = sshll.u32 %s2014_s5, 4  ;;  %s1213_s17 = int_to_ptr.hbm [resolvable:$true] %s1212_s17 }
  0x18   :  { %v158_v19 = vsub.f32 %v81_v6, %v1428_v10  ;;  %v1444_v20 = vsub.f32 %v102_v4, %v1430_v12  ;;  %v1453_v24 = vsub.f32 %v82_v13, %v1437_v17  ;;  %v1469_v39 = vand.u32 4294901760, %v479_v28  ;;  %v473_v49 = vld [vmem:[#allocation8 + $0xc0] sm:$0xff]  ;;  %v471_v52 = vld [vmem:[#allocation8 + $0xb0] sm:$0xff] }
  0x19   :  { %v1447_v21 = vsub.f32 %v95_v11, %v1433_v15  ;;  %v153_v22 = vand.u32 4294901760, %v152_v14  ;;  %v1450_v23 = vsub.f32 %v84_v8, %v1435_v16  ;;  %183 = vmatpush.msra.mxu2 %v146_v18  ;;  %120 = vmatpush.msra.mxu0 %v1424_v5  ;;  %v147_v25 = vand.u32 4294901760, %v146_v18  ;;  %v469_v56 = vld [vmem:[#allocation8 + $0xa0] sm:$0xff]  ;;  %v467_v60 = vld [vmem:[#allocation8 + $0x90] sm:$0xff] }
  0x1a   :  { %v159_v26 = vand.u32 4294901760, %v158_v19  ;;  %v319_v27 = vand.u32 4294901760, %v1444_v20  ;;  %212 = vmatpush.msra.mxu3 %v1424_v5  ;;  %v331_v32 = vand.u32 4294901760, %v1453_v24  ;;  %v1476_v47 = vand.u32 4294901760, %v477_v36  ;;  %v465_v0 = vld [vmem:[#allocation8 + $0x80] sm:$0xff]  ;;  %v463_v6 = vld [vmem:[#allocation8 + $0x70] sm:$0xff] }
  0x1b   :  { %v154_v29 = vsub.f32 %v152_v14, %v153_v22  ;;  %v1459_v30 = vand.u32 4294901760, %v1447_v21  ;;  %v325_v31 = vand.u32 4294901760, %v1450_v23  ;;  %186 = vmatpush.msra.mxu2 %v152_v14  ;;  %v148_v33 = vsub.f32 %v146_v18, %v147_v25  ;;  %122 = vmatpush.msra.mxu0 %v1428_v10  ;;  %v461_v11 = vld [vmem:[#allocation8 + $0x60] sm:$0xff] }
  0x1c   :  { %v160_v34 = vsub.f32 %v158_v19, %v159_v26  ;;  %v320_v35 = vsub.f32 %v1444_v20, %v319_v27  ;;  %214 = vmatpush.msra.mxu3 %v1428_v10  ;;  %v332_v46 = vsub.f32 %v1453_v24, %v331_v32  ;;  %v1480_v50 = vsub.f32 %v479_v28, %v1469_v39  ;;  %v457_v28 = vld [vmem:[#allocation8 + $0x40] sm:$0xff] }
  0x1d   :  { %v126_v37 = vsub.f32 %v1447_v21, %v1459_v30  ;;  %238 = vmatpush.msrb.mxu0 %v147_v25  ;;  %v326_v38 = vsub.f32 %v1450_v23, %v325_v31  ;;  %v149_v40 = vand.u32 4294901760, %v148_v33  ;;  %189 = vmatpush.msra.mxu2 %v158_v19  ;;  %v155_v41 = vand.u32 4294901760, %v154_v29  ;;  %v455_v33 = vld [vmem:[#allocation8 + $0x30] sm:$0xff] }
  0x1e   :  { %218 = vmatmul.f32.vlgmr.msra.gmra.mxu3 %v1459_v30  ;;  %v321_v42 = vand.u32 4294901760, %v320_v35  ;;  %192 = vmatmul.f32.vlgmr.msra.gmra.mxu2 %v1447_v21  ;;  %v161_v48 = vand.u32 4294901760, %v160_v34  ;;  %v1482_v51 = vand.u32 4294901760, %v475_v43  ;;  %v333_v53 = vand.u32 4294901760, %v332_v46 }
  0x1f   :  { %v127_v44 = vand.u32 4294901760, %v126_v37  ;;  %242 = vmatpush.msrb.mxu0 %v153_v22  ;;  %v327_v45 = vand.u32 4294901760, %v326_v38  ;;  %150 = vmatpush.msra.mxu1 %v149_v40  ;;  %v1486_v54 = vsub.f32 %v477_v36, %v1476_v47  ;;  %v1488_v55 = vand.u32 4294901760, %v473_v49  ;;  %v453_v38 = vld [vmem:[#allocation8 + $0x20] sm:$0xff] }
  0x20   :  { %290 = vmatpush.msrb.mxu2 %v1430_v12  ;;  %322 = vmatpush.msrb.mxu3 %v321_v42  ;;  %v530_v57 = vand.u32 4294901760, %v1480_v50  ;;  %v1495_v58 = vsub.f32 %v475_v43, %v1482_v51  ;;  %v1497_v59 = vand.u32 4294901760, %v471_v52  ;;  %v1504_v63 = vand.u32 4294901760, %v469_v56 }
  0x21   :  { %128 = vmatmul.f32.vlgmr.msra.gmra.mxu0 %v127_v44  ;;  %156 = vmatpush.msra.mxu1 %v155_v41  ;;  %v536_v61 = vand.u32 4294901760, %v1486_v54  ;;  %v1502_v62 = vsub.f32 %v473_v49, %v1488_v55  ;;  %v1516_v4 = vand.u32 4294901760, %v467_v60  ;;  %v1580_v37 = vand.u32 4294901760, %v457_v28 }
  0x22   :  { %246 = vmatpush.msrb.mxu0 %v159_v26  ;;  %292 = vmatpush.msrb.mxu2 %v1435_v16  ;;  %v531_v1 = vsub.f32 %v1480_v50, %v530_v57  ;;  %v542_v2 = vand.u32 4294901760, %v1495_v58  ;;  %v1514_v3 = vsub.f32 %v471_v52, %v1497_v59  ;;  %v1592_v43 = vand.u32 4294901760, %v455_v33 }
  0x23   :  { %328 = vmatpush.msrb.mxu3 %v327_v45  ;;  %162 = vmatpush.msra.mxu1 %v161_v48  ;;  %v537_v7 = vsub.f32 %v1486_v54, %v536_v61  ;;  %v548_v8 = vand.u32 4294901760, %v1502_v62  ;;  %v1543_v18 = vsub.f32 %v467_v60, %v1516_v4  ;;  %v451_v45 = vld [vmem:[#allocation8 + $0x10] sm:$0xff]  ;;  %v1602_v49 = vsub.f32 %v457_v28, %v1580_v37 }
  0x24   :  { %355 = vmatpush.msra.mxu0 %v1444_v20  ;;  %164 = vmatmul.f32.vlgmr.msra.gmra.mxu1 %v1433_v15  ;;  %v543_v13 = vsub.f32 %v1495_v58, %v542_v2  ;;  %v554_v14 = vand.u32 4294901760, %v1514_v3  ;;  %v459_v20 = vld [vmem:[#allocation8 + $0x50] sm:$0xff]  ;;  %v1604_v52 = vand.u32 4294901760, %v453_v38 }
  0x25   :  { %294 = vmatpush.msrb.mxu2 %v1437_v17  ;;  %266 = vmatpush.msrb.mxu1 %v1426_v9  ;;  %v1530_v9 = vsub.f32 %v469_v56, %v1504_v63  ;;  %v538_v22 = vand.u32 4294901760, %v537_v7  ;;  %v549_v25 = vsub.f32 %v1502_v62, %v548_v8  ;;  %v449_v56 = vld [vmem:[#allocation8] sm:$0xff] }
  0x26   :  { %334 = vmatpush.msrb.mxu3 %v333_v53  ;;  %300 = vmatmul.f32.vlgmr.msrb.gmra.mxu2 %v127_v44  ;;  %v544_v29 = vand.u32 4294901760, %v543_v13  ;;  %v1626_v13 = vsub.f32 %v453_v38, %v1604_v52 }
  0x27   :  { %410 = vmatpush.msra.mxu2 %v319_v27  ;;  %268 = vmatpush.msrb.mxu1 %v1424_v5  ;;  %v1521_v5 = vand.u32 4294901760, %v465_v0  ;;  %v560_v26 = vand.u32 4294901760, %v1530_v9  ;;  %v1556_v27 = vand.u32 4294901760, %v461_v11  ;;  %v550_v34 = vand.u32 4294901760, %v549_v25 }
  0x28   :  { %438 = vmatpush.msra.mxu3 %v1430_v12  ;;  %358 = vmatpush.msra.mxu0 %v1450_v23  ;;  %v555_v23 = vsub.f32 %v1514_v3, %v554_v14 }
  0x29   :  { %414 = vmatpush.msra.mxu2 %v325_v31  ;;  %248 = vmatmul.f32.vlgmr.msrb.gmra.mxu0 %v1433_v15  ;;  %v1548_v19 = vsub.f32 %v465_v0, %v1521_v5  ;;  %v566_v31 = vand.u32 4294901760, %v1543_v18  ;;  %v561_v35 = vsub.f32 %v1530_v9, %v560_v26  ;;  %v1578_v36 = vsub.f32 %v461_v11, %v1556_v27 }
  0x2a   :  { %270 = vmatpush.msrb.mxu1 %v1428_v10  ;;  %440 = vmatpush.msra.mxu3 %v1435_v16  ;;  %v1534_v10 = vand.u32 4294901760, %v463_v6  ;;  %v556_v40 = vand.u32 4294901760, %v555_v23  ;;  %v478_v23 = vld [vmem:[#allocation8 + $0xe8] sm:$0xff] }
  0x2b   :  { %418 = vmatpush.msra.mxu2 %v331_v32  ;;  %336 = vmatmul.f32.vlgmr.msrb.gmra.mxu3 %v1433_v15  ;;  %v1568_v32 = vand.u32 4294901760, %v459_v20  ;;  %v567_v41 = vsub.f32 %v1543_v18, %v566_v31  ;;  %v562_v46 = vand.u32 4294901760, %v561_v35  ;;  %v584_v48 = vand.u32 4294901760, %v1578_v36 }
  0x2c   :  { %382 = vmatpush.msra.mxu1 %v1430_v12  ;;  %v532_v12 = vand.u32 4294901760, %v531_v1  ;;  %442 = vmatpush.msra.mxu3 %v1437_v17  ;;  %v1614_v1 = vsub.f32 %v455_v33, %v1592_v43  ;;  %v2015_v35 = vand.u32 4294901760, %v1626_v13 }
  0x2d   :  { %631 = vmatpush.msrb.mxu2 %v1480_v50  ;;  %272 = vmatmul.f32.vlgmr.msrb.gmra.mxu1 %v1433_v15  ;;  %v1590_v42 = vsub.f32 %v459_v20, %v1568_v32  ;;  %v568_v60 = vand.u32 4294901760, %v567_v41  ;;  %v585_v11 = vsub.f32 %v1578_v36, %v584_v48  ;;  %v1628_v20 = vand.u32 4294901760, %v449_v56 }
  0x2e   :  { %384 = vmatpush.msra.mxu1 %v1435_v16  ;;  %684 = vmatpush.msrb.mxu3 %v1469_v39  ;;  %v1561_v16 = vsub.f32 %v463_v6, %v1534_v10  ;;  %v1616_v6 = vand.u32 4294901760, %v451_v45  ;;  %v2017_v28 = vand.u32 4294901760, %v1614_v1  ;;  %v2022_v50 = vand.u32 4294901760, %v1602_v49 }
  0x2f   :  { %634 = vmatpush.msrb.mxu2 %v1486_v54  ;;  %361 = vmatpush.msra.mxu0 %v1453_v24  ;;  %v590_v0 = vand.u32 4294901760, %v1590_v42  ;;  %v586_v33 = vand.u32 4294901760, %v585_v11  ;;  %v1650_v38 = vsub.f32 %v449_v56, %v1628_v20  ;;  %v2024_v54 = vand.u32 4294901760, %v1626_v13 }
  0x30   :  { %386 = vmatpush.msra.mxu1 %v1437_v17  ;;  %686 = vmatpush.msrb.mxu3 %v1476_v47  ;;  %v572_v17 = vand.u32 4294901760, %v1548_v19  ;;  %v578_v24 = vand.u32 4294901760, %v1561_v16 }
  0x31   :  { %637 = vmatpush.msrb.mxu2 %v1495_v58  ;;  %488 = vmatpush.msrb.mxu0 %v1469_v39  ;;  %v468_v58 = vld [vmem:[#allocation8 + $0x98] sm:$0xff] }
  0x32   :  { %533 = vmatpush.msrb.mxu1 %v532_v12  ;;  %688 = vmatpush.msrb.mxu3 %v1482_v51  ;;  %v573_v44 = vsub.f32 %v1548_v19, %v572_v17  ;;  %v579_v53 = vsub.f32 %v1561_v16, %v578_v24  ;;  %v2019_v12 = vand.u32 4294901760, %v1602_v49 }
  0x33   :  { %640 = vmatpush.msrb.mxu2 %v1502_v62  ;;  %490 = vmatpush.msrb.mxu0 %v1476_v47  ;;  %v466_v62 = vld [vmem:[#allocation8 + $0x88] sm:$0xff] }
  0x34   :  { %539 = vmatpush.msrb.mxu1 %v538_v22  ;;  %690 = vmatpush.msrb.mxu3 %v1488_v55  ;;  %v574_v7 = vand.u32 4294901760, %v573_v44  ;;  %v480_v22 = vld [vmem:[#allocation8 + $0xf8] sm:$0xff]  ;;  %v580_v25 = vand.u32 4294901760, %v579_v53  ;;  %v603_v44 = vsub.f32 %v1614_v1, %v2017_v28  ;;  %v474_v53 = vld [vmem:[#allocation8 + $0xc8] sm:$0xff] }
  0x35   :  { %643 = vmatpush.msrb.mxu2 %v1514_v3  ;;  %492 = vmatpush.msrb.mxu0 %v1482_v51 }
  0x36   :  { %545 = vmatpush.msrb.mxu1 %v544_v29  ;;  %692 = vmatpush.msrb.mxu3 %v1497_v59  ;;  %v1638_v29 = vsub.f32 %v451_v45, %v1616_v6 }
  0x37   :  { %646 = vmatpush.msrb.mxu2 %v1530_v9  ;;  %494 = vmatpush.msrb.mxu0 %v1488_v55 }
  0x38   :  { %551 = vmatpush.msrb.mxu1 %v550_v34  ;;  %420 = vmatmul.f32.vlgmr.msra.gmra.mxu2 %v1433_v15  ;;  %v597_v34 = vsub.f32 %v1602_v49, %v2019_v12  ;;  %v2016_v45 = vand.u32 4294901760, %v1638_v29 }
  0x39   :  { %649 = vmatpush.msrb.mxu2 %v1543_v18  ;;  %694 = vmatpush.msrb.mxu3 %v1504_v63 }
  0x3a   :  { %557 = vmatpush.msrb.mxu1 %v556_v40  ;;  %364 = vmatmul.f32.vlgmr.msra.gmra.mxu0 %v1447_v21  ;;  %v591_v21 = vsub.f32 %v1590_v42, %v590_v0  ;;  %v476_v40 = vld [vmem:[#allocation8 + $0xd8] sm:$0xff]  ;;  %v598_v56 = vand.u32 4294901760, %v597_v34  ;;  %v1682_v34 = vand.u32 4294901760, %v474_v53 }
  0x3b   :  { %444 = vmatmul.f32.vlgmr.msra.gmra.mxu3 %v1433_v15  ;;  %496 = vmatpush.msrb.mxu0 %v1497_v59  ;;  %v1642_v15 = vand.u32 4294901760, %v480_v22  ;;  %v1671_v11 = vand.u32 4294901760, %v476_v40 }
  0x3c   :  { %563 = vmatpush.msrb.mxu1 %v562_v46  ;;  %652 = vmatpush.msrb.mxu2 %v1548_v19  ;;  %v592_v41 = vand.u32 4294901760, %v591_v21  ;;  %v604_v21 = vand.u32 4294901760, %v603_v44 }
  0x3d   :  { %696 = vmatpush.msrb.mxu3 %v1516_v4  ;;  %390 = vmatmul.f32.vlgmr.msra.gmra.mxu1 %v1459_v30  ;;  %v1654_v30 = vand.u32 4294901760, %v478_v23  ;;  %v1664_v46 = vsub.f32 %v480_v22, %v1642_v15  ;;  %v1692_v44 = vsub.f32 %v476_v40, %v1671_v11 }
  0x3e   :  { %569 = vmatpush.msrb.mxu1 %v568_v60  ;;  %498 = vmatpush.msrb.mxu0 %v1504_v63  ;;  %v609_v60 = vsub.f32 %v1626_v13, %v2015_v35 }
  0x3f   :  { %655 = vmatpush.msrb.mxu2 %v1561_v16  ;;  %698 = vmatpush.msrb.mxu3 %v1521_v5  ;;  %v1676_v22 = vsub.f32 %v478_v23, %v1654_v30  ;;  %v871_v35 = vand.u32 4294901760, %v1664_v46 }
  0x40   :  { %575 = vmatpush.msrb.mxu1 %v574_v7  ;;  %500 = vmatpush.msrb.mxu0 %v1516_v4  ;;  %v2018_v7 = vand.u32 4294901760, %v1650_v38  ;;  %v610_v23 = vand.u32 4294901760, %v609_v60  ;;  %v1701_v60 = vsub.f32 %v474_v53, %v1682_v34 }
  0x41   :  { %658 = vmatpush.msrb.mxu2 %v1578_v36  ;;  %700 = vmatpush.msrb.mxu3 %v1534_v10  ;;  %v877_v28 = vand.u32 4294901760, %v1676_v22  ;;  %v872_v40 = vsub.f32 %v1664_v46, %v871_v35 }
  0x42   :  { %581 = vmatpush.msrb.mxu1 %v580_v25  ;;  %502 = vmatpush.msrb.mxu0 %v1521_v5  ;;  %v472_v25 = vld [vmem:[#allocation8 + $0xb8] sm:$0xff] }
  0x43   :  { %661 = vmatpush.msrb.mxu2 %v1590_v42  ;;  %702 = vmatpush.msrb.mxu3 %v1556_v27  ;;  %v878_v53 = vsub.f32 %v1676_v22, %v877_v28  ;;  %v458_v42 = vld [vmem:[#allocation8 + $0x48] sm:$0xff] }
  0x44   :  { %587 = vmatpush.msrb.mxu1 %v586_v33  ;;  %504 = vmatpush.msrb.mxu0 %v1534_v10  ;;  %v615_v33 = vsub.f32 %v1638_v29, %v2016_v45  ;;  %v1694_v45 = vand.u32 4294901760, %v472_v25 }
  0x45   :  { %664 = vmatpush.msrb.mxu2 %v1602_v49  ;;  %704 = vmatpush.msrb.mxu3 %v1568_v32  ;;  %v1836_v49 = vand.u32 4294901760, %v458_v42 }
  0x46   :  { %593 = vmatpush.msrb.mxu1 %v592_v41  ;;  %506 = vmatpush.msrb.mxu0 %v1556_v27  ;;  %v621_v41 = vsub.f32 %v1650_v38, %v2018_v7  ;;  %v1711_v12 = vsub.f32 %v472_v25, %v1694_v45 }
  0x47   :  { %667 = vmatpush.msrb.mxu2 %v1614_v1  ;;  %706 = vmatpush.msrb.mxu3 %v1580_v37 }
  0x48   :  { %599 = vmatpush.msrb.mxu1 %v598_v56  ;;  %508 = vmatpush.msrb.mxu0 %v1568_v32  ;;  %v616_v56 = vand.u32 4294901760, %v615_v33  ;;  %v622_v7 = vand.u32 4294901760, %v621_v41  ;;  %v2020_v33 = vand.u32 4294901760, %v1701_v60  ;;  %v895_v41 = vand.u32 4294901760, %v1711_v12 }
  0x49   :  { %670 = vmatpush.msrb.mxu2 %v1626_v13  ;;  %708 = vmatpush.msrb.mxu3 %v1592_v43 }
  0x4a   :  { %605 = vmatpush.msrb.mxu1 %v604_v21  ;;  %510 = vmatpush.msrb.mxu0 %v1580_v37  ;;  %v883_v21 = vand.u32 4294901760, %v1692_v44 }
  0x4b   :  { %673 = vmatpush.msrb.mxu2 %v1638_v29  ;;  %710 = vmatpush.msrb.mxu3 %v1604_v52 }
  0x4c   :  { %611 = vmatpush.msrb.mxu1 %v610_v23  ;;  %512 = vmatpush.msrb.mxu0 %v1592_v43  ;;  %v873_v23 = vand.u32 4294901760, %v872_v40  ;;  %v884_v25 = vsub.f32 %v1692_v44, %v883_v21 }
  0x4d   :  { %676 = vmatpush.msrb.mxu2 %v1650_v38  ;;  %712 = vmatpush.msrb.mxu3 %v1616_v6 }
  0x4e   :  { %617 = vmatpush.msrb.mxu1 %v616_v56  ;;  %514 = vmatpush.msrb.mxu0 %v1604_v52  ;;  %v879_v56 = vand.u32 4294901760, %v878_v53  ;;  %v885_v40 = vand.u32 4294901760, %v884_v25  ;;  %v470_v53 = vld [vmem:[#allocation8 + $0xa8] sm:$0xff] }
  0x4f   :  { %829 = vmatpush.msra.mxu2 %v1642_v15  ;;  %714 = vmatpush.msrb.mxu3 %v1628_v20 }
  0x50   :  { %623 = vmatpush.msrb.mxu1 %v622_v7  ;;  %v890_v7 = vsub.f32 %v1701_v60, %v2020_v33  ;;  %516 = vmatpush.msrb.mxu0 %v1616_v6 }
  0x51   :  { %831 = vmatpush.msra.mxu2 %v1654_v30  ;;  %874 = vmatpush.msra.mxu3 %v873_v23 }
  0x52   :  { %792 = vmatpush.msra.mxu1 %v1469_v39  ;;  %v896_v39 = vsub.f32 %v1711_v12, %v895_v41  ;;  %518 = vmatpush.msrb.mxu0 %v1628_v20  ;;  %v891_v33 = vand.u32 4294901760, %v890_v7 }
  0x53   :  { %833 = vmatpush.msra.mxu2 %v1671_v11  ;;  %880 = vmatpush.msra.mxu3 %v879_v56 }
  0x54   :  { %794 = vmatpush.msra.mxu1 %v1476_v47  ;;  %725 = vmatpush.msra.mxu0 %v530_v57  ;;  %v1747_v47 = vand.u32 4294901760, %v470_v53  ;;  %v897_v23 = vand.u32 4294901760, %v896_v39  ;;  %v2026_v57 = vand.u32 4294901760, %v1650_v38 }
  0x55   :  { %835 = vmatpush.msra.mxu2 %v1682_v34  ;;  %886 = vmatpush.msra.mxu3 %v885_v40 }
  0x56   :  { %796 = vmatpush.msra.mxu1 %v1482_v51  ;;  %729 = vmatpush.msra.mxu0 %v536_v61  ;;  %v2023_v51 = vand.u32 4294901760, %v1614_v1  ;;  %v1795_v61 = vsub.f32 %v470_v53, %v1747_v47  ;;  %v456_v1 = vld [vmem:[#allocation8 + $0x38] sm:$0xff] }
  0x57   :  { %837 = vmatpush.msra.mxu2 %v1694_v45  ;;  %892 = vmatpush.msra.mxu3 %v891_v33  ;;  %v454_v33 = vld [vmem:[#allocation8 + $0x28] sm:$0xff]  ;;  %v452_v53 = vld [vmem:[#allocation8 + $0x18] sm:$0xff] }
  0x58   :  { %798 = vmatpush.msra.mxu1 %v1488_v55  ;;  %733 = vmatpush.msra.mxu0 %v542_v2  ;;  %v2025_v55 = vand.u32 4294901760, %v1638_v29  ;;  %v1799_v2 = vand.u32 4294901760, %v466_v62  ;;  %v1852_v29 = vsub.f32 %v458_v42, %v1836_v49  ;;  %v1859_v40 = vand.u32 4294901760, %v454_v33 }
  0x59   :  { %839 = vmatpush.msra.mxu2 %v1747_v47  ;;  %898 = vmatpush.msra.mxu3 %v897_v23 }
  0x5a   :  { %800 = vmatpush.msra.mxu1 %v1497_v59  ;;  %737 = vmatpush.msra.mxu0 %v548_v8  ;;  %v1792_v59 = vand.u32 4294901760, %v468_v58  ;;  %v937_v7 = vand.u32 4294901760, %v1852_v29 }
  0x5c   :  { %802 = vmatpush.msra.mxu1 %v1504_v63  ;;  %741 = vmatpush.msra.mxu0 %v554_v14  ;;  %v901_v63 = vand.u32 4294901760, %v1795_v61  ;;  %v1802_v3 = vsub.f32 %v468_v58, %v1792_v59  ;;  %v462_v14 = vld [vmem:[#allocation8 + $0x68] sm:$0xff] }
  0x5d   :  { %841 = vmatpush.msra.mxu2 %v1792_v59 }
  0x5e   :  { %804 = vmatpush.msra.mxu1 %v1516_v4  ;;  %745 = vmatpush.msra.mxu0 %v560_v26  ;;  %v464_v4 = vld [vmem:[#allocation8 + $0x78] sm:$0xff]  ;;  %v907_v8 = vand.u32 4294901760, %v1802_v3 }
  0x5f   :  { %843 = vmatpush.msra.mxu2 %v1799_v2  ;;  %v1809_v9 = vand.u32 4294901760, %v464_v4 }
  0x60   :  { %806 = vmatpush.msra.mxu1 %v1521_v5  ;;  %749 = vmatpush.msra.mxu0 %v566_v31  ;;  %v902_v5 = vsub.f32 %v1795_v61, %v901_v63  ;;  %v908_v19 = vsub.f32 %v1802_v3, %v907_v8  ;;  %v460_v31 = vld [vmem:[#allocation8 + $0x58] sm:$0xff] }
  0x61   :  { %845 = vmatpush.msra.mxu2 %v1809_v9  ;;  %v1822_v16 = vsub.f32 %v464_v4, %v1809_v9  ;;  %v1828_v36 = vand.u32 4294901760, %v460_v31 }
  0x62   :  { %808 = vmatpush.msra.mxu1 %v1534_v10  ;;  %753 = vmatpush.msra.mxu0 %v572_v17  ;;  %v1812_v10 = vsub.f32 %v466_v62, %v1799_v2  ;;  %v903_v18 = vand.u32 4294901760, %v902_v5  ;;  %v450_v62 = vld [vmem:[#allocation8 + $0x8] sm:$0xff] }
  0x63   :  { %v1879_v5 = vand.u32 4294901760, %v450_v62 }
  0x64   :  { %810 = vmatpush.msra.mxu1 %v1556_v27  ;;  %757 = vmatpush.msra.mxu0 %v578_v24  ;;  %v913_v26 = vand.u32 4294901760, %v1812_v10  ;;  %v1819_v27 = vand.u32 4294901760, %v462_v14  ;;  %v919_v24 = vand.u32 4294901760, %v1822_v16 }
  0x65   :  { %904 = vmatpush.msra.mxu3 %v903_v18 }
  0x66   :  { %812 = vmatpush.msra.mxu1 %v1568_v32  ;;  %761 = vmatpush.msra.mxu0 %v584_v48  ;;  %v909_v32 = vand.u32 4294901760, %v908_v19  ;;  %v914_v17 = vsub.f32 %v1812_v10, %v913_v26 }
  0x67   :  { %847 = vmatpush.msra.mxu2 %v1819_v27 }
  0x68   :  { %814 = vmatpush.msra.mxu1 %v1580_v37  ;;  %765 = vmatpush.msra.mxu0 %v590_v0  ;;  %v1831_v37 = vsub.f32 %v462_v14, %v1819_v27  ;;  %v920_v0 = vsub.f32 %v1822_v16, %v919_v24 }
  0x69   :  { %910 = vmatpush.msra.mxu3 %v909_v32  ;;  %849 = vmatpush.msra.mxu2 %v1828_v36  ;;  %v1890_v32 = vsub.f32 %v450_v62, %v1879_v5 }
  0x6a   :  { %816 = vmatpush.msra.mxu1 %v1592_v43  ;;  %769 = vmatpush.msra.mxu0 %v2022_v50  ;;  %v915_v43 = vand.u32 4294901760, %v914_v17  ;;  %v925_v48 = vand.u32 4294901760, %v1831_v37  ;;  %v921_v38 = vand.u32 4294901760, %v920_v0  ;;  %v938_v50 = vsub.f32 %v1852_v29, %v937_v7 }
  0x6b   :  { %851 = vmatpush.msra.mxu2 %v1836_v49 }
  0x6c   :  { %818 = vmatpush.msra.mxu1 %v1604_v52  ;;  %773 = vmatpush.msra.mxu0 %v2023_v51  ;;  %v1839_v52 = vsub.f32 %v460_v31, %v1828_v36  ;;  %v1868_v51 = vand.u32 4294901760, %v452_v53 }
  0x6d   :  { %916 = vmatpush.msra.mxu3 %v915_v43  ;;  %v2021_v43 = vand.u32 4294901760, %v1890_v32 }
  0x6e   :  { %820 = vmatpush.msra.mxu1 %v1616_v6  ;;  %777 = vmatpush.msra.mxu0 %v2024_v54  ;;  %v926_v6 = vsub.f32 %v1831_v37, %v925_v48  ;;  %v931_v13 = vand.u32 4294901760, %v1839_v52  ;;  %v1871_v54 = vsub.f32 %v454_v33, %v1859_v40  ;;  %v1882_v14 = vsub.f32 %v452_v53, %v1868_v51 }
  0x6f   :  { %922 = vmatpush.msra.mxu3 %v921_v38  ;;  %v1899_v38 = vld [vmem:[#allocation7] sm:$0x3] }
  0x70   :  { %822 = vmatpush.msra.mxu1 %v1628_v20  ;;  %781 = vmatpush.msra.mxu0 %v2025_v55  ;;  %v1849_v20 = vand.u32 4294901760, %v456_v1  ;;  %v927_v25 = vand.u32 4294901760, %v926_v6  ;;  %v932_v56 = vsub.f32 %v1839_v52, %v931_v13  ;;  %v949_v58 = vand.u32 4294901760, %v1871_v54 }
  0x71   :  { %v955_v31 = vand.u32 4294901760, %v1882_v14  ;;  %v89_v33 = vperm.slane %v1899_v38, 0 }
  0x72   :  { %785 = vmatpush.msra.mxu0 %v2026_v57  ;;  %853 = vmatpush.msra.mxu2 %v1849_v20  ;;  %v1862_v39 = vsub.f32 %v456_v1, %v1849_v20  ;;  %v933_v23 = vand.u32 4294901760, %v932_v56  ;;  %v939_v57 = vand.u32 4294901760, %v938_v50  ;;  %v950_v18 = vsub.f32 %v1871_v54, %v949_v58 }
  0x73   :  { %928 = vmatpush.msra.mxu3 %v927_v25  ;;  %v956_v42 = vsub.f32 %v1882_v14, %v955_v31  ;;  %v962_v1 = vsub.f32 %v1890_v32, %v2021_v43 }
  0x74   :  { %855 = vmatpush.msra.mxu2 %v1859_v40  ;;  %v943_v55 = vand.u32 4294901760, %v1862_v39  ;;  %v951_v17 = vand.u32 4294901760, %v950_v18 }
  0x75   :  { %934 = vmatpush.msra.mxu3 %v933_v23  ;;  %v957_v0 = vand.u32 4294901760, %v956_v42  ;;  %v963_v6 = vand.u32 4294901760, %v962_v1 }
  0x76   :  { %857 = vmatpush.msra.mxu2 %v1868_v51  ;;  %v944_v4 = vsub.f32 %v1862_v39, %v943_v55 }
  0x77   :  { %940 = vmatpush.msra.mxu3 %v939_v57 }
  0x78   :  { %v945_v19 = vand.u32 4294901760, %v944_v4  ;;  %859 = vmatpush.msra.mxu2 %v1879_v5 }
  0x7a   :  { %946 = vmatpush.msra.mxu3 %v945_v19 }
  0x7c   :  { %952 = vmatpush.msra.mxu3 %v951_v17 }
  0x7e   :  { %958 = vmatpush.msra.mxu3 %v957_v0 }
  0x80   :  { %964 = vmatpush.msra.mxu3 %v963_v6 }
  0x9e   :  { %v129_v25 = vpop.f32.mrf.mxu0 }
  0x9f   :  { %v130_v56 = vadd.f32 %v129_v25, %v89_v33 }
  0xa1   :  { %v165_v53 = vpop.f32.mrf.mxu1  ;;  %v193_v23 = vpop.f32.mrf.mxu2 }
  0xa2   :  { %v166_v50 = vadd.f32 %v165_v53, %v130_v56  ;;  %v219_v57 = vpop.f32.mrf.mxu3 }
  0xa4   :  { %v194_v62 = vadd.f32 %v193_v23, %v166_v50 }
  0xa6   :  { %v249_v4 = vpop.f32.mrf.mxu0  ;;  %v220_v18 = vadd.f32 %v219_v57, %v194_v62 }
  0xa8   :  { %v250_v19 = vadd.f32 %v249_v4, %v220_v18 }
  0xaa   :  { %v273_v17 = vpop.f32.mrf.mxu1 }
  0xab   :  { %v274_v42 = vadd.f32 %v273_v17, %v250_v19 }
  0xad   :  { %v448_v43 = vmax.f32 %v274_v42, 0.0 }
  0xaf   :  { %v1902_v0 = vand.u32 4294901760, %v448_v43 }
  0xb1   :  { %v1905_v1 = vsub.f32 %v448_v43, %v1902_v0  ;;  %625 = vmatmul.f32.vlgmr.msrb.gmra.mxu1 %v1902_v0 }
  0xb2   :  { %1025 = vmatpush.msrb.mxu1 %v1642_v15 }
  0xb3   :  { %679 = vmatmul.f32.vlgmr.msrb.gmra.mxu2 %v1905_v1  ;;  %v1911_v6 = vand.u32 4294901760, %v1905_v1 }
  0xb4   :  { %1027 = vmatpush.msrb.mxu1 %v1654_v30  ;;  %1066 = vmatpush.msrb.mxu2 %v871_v35  ;;  %v2027_v35 = vand.u32 4294901760, %v1701_v60 }
  0xb5   :  { %718 = vmatmul.f32.vlgmr.msrb.gmra.mxu3 %v1911_v6  ;;  %v522_v43 = vsub.f32 %v1905_v1, %v1911_v6 }
  0xb6   :  { %1029 = vmatpush.msrb.mxu1 %v1671_v11  ;;  %1070 = vmatpush.msrb.mxu2 %v877_v28  ;;  %v301_v28 = vpop.f32.mrf.mxu2 }
  0xb7   :  { %1133 = vmatpush.msrb.mxu3 %v1642_v15  ;;  %v523_v33 = vand.u32 4294901760, %v522_v43  ;;  %v337_v15 = vpop.f32.mrf.mxu3 }
  0xb8   :  { %1031 = vmatpush.msrb.mxu1 %v1682_v34  ;;  %1074 = vmatpush.msrb.mxu2 %v883_v21  ;;  %v481_v21 = vld [vmem:[%s2013_s4] sm:$0x3]  ;;  %s1380_s4 = smov 64  }
  0xb9   :  { %1135 = vmatpush.msrb.mxu3 %v1654_v30  ;;  %524 = vmatmul.f32.vlgmr.msrb.gmra.mxu0 %v523_v33  ;;  %v365_v30 = vpop.f32.mrf.mxu0 }
  0xba   :  { %824 = vmatmul.f32.vlgmr.msra.gmra.mxu1 %v1902_v0  ;;  %972 = vmatpush.msrb.mxu0 %v1664_v46  ;;  %v391_v46 = vpop.f32.mrf.mxu1 }
  0xbb   :  { %1033 = vmatpush.msrb.mxu1 %v1694_v45  ;;  %1078 = vmatpush.msrb.mxu2 %v2027_v35 }
  0xbc   :  { %1137 = vmatpush.msrb.mxu3 %v1671_v11  ;;  %865 = vmatmul.f32.vlgmr.msra.gmra.mxu2 %v523_v33 }
  0xbd   :  { %975 = vmatpush.msrb.mxu0 %v1676_v22  ;;  %1035 = vmatpush.msrb.mxu1 %v1747_v47 }
  0xbe   :  { %1082 = vmatpush.msrb.mxu2 %v895_v41  ;;  %1139 = vmatpush.msrb.mxu3 %v1682_v34  ;;  %v484_v41 = vperm.slane %v481_v21, 1 }
  0xbf   :  { %966 = vmatmul.f32.vlgmr.msra.gmra.mxu3 %v1902_v0  ;;  %978 = vmatpush.msrb.mxu0 %v1692_v44  ;;  %v445_v11 = vpop.f32.mrf.mxu3 }
  0xc0   :  { %1037 = vmatpush.msrb.mxu1 %v1792_v59  ;;  %1086 = vmatpush.msrb.mxu2 %v901_v63 }
  0xc1   :  { %1141 = vmatpush.msrb.mxu3 %v1694_v45  ;;  %981 = vmatpush.msrb.mxu0 %v1701_v60  ;;  %v421_v45 = vpop.f32.mrf.mxu2 }
  0xc2   :  { %1039 = vmatpush.msrb.mxu1 %v1799_v2  ;;  %1090 = vmatpush.msrb.mxu2 %v907_v8 }
  0xc3   :  { %1143 = vmatpush.msrb.mxu3 %v1747_v47  ;;  %787 = vmatmul.f32.vlgmr.msra.gmra.mxu0 %v1902_v0 }
  0xc4   :  { %984 = vmatpush.msrb.mxu0 %v1711_v12  ;;  %1041 = vmatpush.msrb.mxu1 %v1809_v9  ;;  %v2028_v12 = vand.u32 4294901760, %v1890_v32 }
  0xc5   :  { %1094 = vmatpush.msrb.mxu2 %v913_v26  ;;  %1145 = vmatpush.msrb.mxu3 %v1792_v59 }
  0xc6   :  { %987 = vmatpush.msrb.mxu0 %v1795_v61  ;;  %1043 = vmatpush.msrb.mxu1 %v1819_v27 }
  0xc7   :  { %1098 = vmatpush.msrb.mxu2 %v919_v24  ;;  %1147 = vmatpush.msrb.mxu3 %v1799_v2 }
  0xc8   :  { %990 = vmatpush.msrb.mxu0 %v1802_v3  ;;  %1045 = vmatpush.msrb.mxu1 %v1828_v36 }
  0xc9   :  { %1102 = vmatpush.msrb.mxu2 %v925_v48  ;;  %1149 = vmatpush.msrb.mxu3 %v1809_v9 }
  0xca   :  { %993 = vmatpush.msrb.mxu0 %v1812_v10  ;;  %1047 = vmatpush.msrb.mxu1 %v1836_v49 }
  0xcb   :  { %1106 = vmatpush.msrb.mxu2 %v931_v13  ;;  %1151 = vmatpush.msrb.mxu3 %v1819_v27 }
  0xcc   :  { %996 = vmatpush.msrb.mxu0 %v1822_v16  ;;  %1049 = vmatpush.msrb.mxu1 %v1849_v20 }
  0xcd   :  { %1110 = vmatpush.msrb.mxu2 %v937_v7  ;;  %1153 = vmatpush.msrb.mxu3 %v1828_v36 }
  0xce   :  { %999 = vmatpush.msrb.mxu0 %v1831_v37  ;;  %1051 = vmatpush.msrb.mxu1 %v1859_v40 }
  0xcf   :  { %1114 = vmatpush.msrb.mxu2 %v943_v55  ;;  %1155 = vmatpush.msrb.mxu3 %v1836_v49 }
  0xd0   :  { %1002 = vmatpush.msrb.mxu0 %v1839_v52  ;;  %1053 = vmatpush.msrb.mxu1 %v1868_v51  ;;  %v90_v52 = vperm.slane %v1899_v38, 1 }
  0xd1   :  { %1118 = vmatpush.msrb.mxu2 %v949_v58  ;;  %1157 = vmatpush.msrb.mxu3 %v1849_v20 }
  0xd2   :  { %1005 = vmatpush.msrb.mxu0 %v1852_v29  ;;  %1055 = vmatpush.msrb.mxu1 %v1879_v5  ;;  %v483_v29 = vperm.slane %v481_v21, 0  ;;  %v302_v7 = vadd.f32 %v301_v28, %v90_v52 }
  0xd3   :  { %1122 = vmatpush.msrb.mxu2 %v955_v31  ;;  %1159 = vmatpush.msrb.mxu3 %v1859_v40 }
  0xd4   :  { %1059 = vmatmul.f32.vlgmr.msrb.gmra.mxu1 %v1911_v6  ;;  %1008 = vmatpush.msrb.mxu0 %v1862_v39  ;;  %v338_v39 = vadd.f32 %v337_v15, %v302_v7 }
  0xd5   :  { %1126 = vmatpush.msrb.mxu2 %v2028_v12  ;;  %1161 = vmatpush.msrb.mxu3 %v1868_v51 }
  0xd6   :  { %1128 = vmatmul.f32.vlgmr.msrb.gmra.mxu2 %v1902_v0  ;;  %1011 = vmatpush.msrb.mxu0 %v1871_v54 }
  0xd7   :  { %1163 = vmatpush.msrb.mxu3 %v1879_v5  ;;  %v366_v5 = vadd.f32 %v365_v30, %v338_v39 }
  0xd8   :  { %1165 = vmatmul.f32.vlgmr.msrb.gmra.mxu3 %v1902_v0  ;;  %1014 = vmatpush.msrb.mxu0 %v1882_v14 }
  0xd9   :  { %v392_v31 = vadd.f32 %v391_v46, %v366_v5  ;;  %v1197_v46 = vlaneseq }
  0xda   :  { %1017 = vmatpush.msrb.mxu0 %v1890_v32 }
  0xdb   :  { %1020 = vmatmul.f32.vlgmr.msrb.gmra.mxu0 %v1905_v1  ;;  %v422_v56 = vadd.f32 %v421_v45, %v392_v31 }
  0xdd   :  { %v446_v50 = vadd.f32 %v445_v11, %v422_v56  ;;  %v1198_v11 = vand.u32 127, %v1197_v46 }
  0xdf   :  { %v1183_v6 = vmul.f32 %v446_v50, %v446_v50  ;;  %vm1199_vm2 = vcmp.lt.s32.totalorder %v1198_v11, 64 }
  0xe1   :  { %v1184_v35 = vmul.f32 -0.5, %v1183_v6 }
 0x12e   :  { %v626_v44 = vpop.f32.mrf.mxu1 }
 0x136   :  { %v525_v22 = vpop.f32.mrf.mxu0  ;;  %v680_v34 = vpop.f32.mrf.mxu2 }
 0x137   :  { %v825_v61 = vpop.f32.mrf.mxu1  ;;  %v526_v40 = vadd.f32 %v525_v22, %v483_v29 }
 0x138   :  { %v719_v60 = vpop.f32.mrf.mxu3 }
 0x139   :  { %v627_v55 = vadd.f32 %v626_v44, %v526_v40 }
 0x13b   :  { %v681_v14 = vadd.f32 %v680_v34, %v627_v55 }
 0x13d   :  { %v720_v32 = vadd.f32 %v719_v60, %v681_v14 }
 0x13f   :  { %v866_v59 = vpop.f32.mrf.mxu2 }
 0x140   :  { %v788_v47 = vpop.f32.mrf.mxu0  ;;  %v867_v63 = vadd.f32 %v866_v59, %v484_v41 }
 0x141   :  { %v789_v53 = vadd.f32 %v788_v47, %v720_v32 }
 0x142   :  { %v967_v2 = vpop.f32.mrf.mxu3 }
 0x143   :  { %v968_v3 = vadd.f32 %v967_v2, %v867_v63  ;;  %v826_v62 = vadd.f32 %v825_v61, %v789_v53 }
 0x151   :  { %v1060_v10 = vpop.f32.mrf.mxu1 }
 0x158   :  { %v1021_v8 = vpop.f32.mrf.mxu0 }
 0x159   :  { %v1022_v9 = vadd.f32 %v1021_v8, %v968_v3  ;;  %v1129_v27 = vpop.f32.mrf.mxu2 }
 0x15b   :  { %v1061_v26 = vadd.f32 %v1060_v10, %v1022_v9  ;;  %v1166_v36 = vpop.f32.mrf.mxu3 }
 0x15d   :  { %v1130_v16 = vadd.f32 %v1129_v27, %v1061_v26 }
 0x15f   :  { %v1167_v37 = vadd.f32 %v1166_v36, %v1130_v16 }
 0x161   :  { %v1169_v24 = vmax.f32 %v1167_v37, 0.0 }
 0x163   :  { %v1170_v48 = vsub.f32 %v1167_v37, %v1169_v24  ;;  %v1173_v49 = vsub.f32 0.0, %v1169_v24 }
 0x165   :  { %v1171_v13 = vmul.f32 1.442695, %v1170_v48  ;;  %v1174_v20 = vmul.f32 1.442695, %v1173_v49 }
 0x167   :  { %1232 = vpow2.f32 %v1171_v13 }
 0x168   :  { %1234 = vpow2.f32 %v1174_v20 }
 0x16d   :  { %v1233_v51 = vpop.eup %1232 }
 0x16e   :  { %v1235_v54 = vpop.eup %1234 }
 0x16f   :  { %v1176_v58 = vadd.f32 %v1235_v54, %v1233_v51 }
 0x171   :  { %1236 = vlog2.f32 %v1176_v58 }
 0x177   :  { %v1237_v25 = vpop.eup %1236 }
 0x178   :  { %v1178_v38 = vmul.f32 0.6931472, %v1237_v25 }
 0x17a   :  { %v1179_v23 = vadd.f32 %v1178_v38, %v1169_v24 }
 0x17c   :  { %v1180_v57 = vmax.f32 %v1179_v23, 1e-37 }
 0x17e   :  { %v1181_v4 = vmul.f32 %v1180_v57, %v446_v50 }
 0x180   :  { %v1182_v18 = vadd.f32 %v1181_v4, %v826_v62 }
 0x182   :  { %1238 = vtanh.f32 %v1182_v18 }
 0x188   :  { %v1239_v19 = vpop.eup %1238 }
 0x189   :  { %1240 = vtanh.f32 %v1239_v19  ;;  %v1200_v22 = vmul.f32 2.0, %v1239_v19 }
 0x18a   :  { %1242 = vlog2.f32 %v1180_v57 }
 0x18f   :  { %v1241_v17 = vpop.eup %1240 }
 0x190   :  { %v1191_v42 = vmul.f32 %v1241_v17, %v1241_v17  ;;  %v1243_v0 = vpop.eup %1242 }
 0x191   :  { %v1186_v33 = vmul.f32 0.6931472, %v1243_v0 }
 0x192   :  { %v1192_v1 = vsub.f32 1.0, %v1191_v42 }
 0x193   :  { %v1187_v12 = vsub.f32 %v1184_v35, %v1186_v33 }
 0x194   :  { %v1193_v43 = vadd.f32 1e-07, %v1192_v1 }
 0x195   :  { %v1188_v15 = vadd.f32 -0.9189385, %v1187_v12 }
 0x196   :  { %1244 = vlog2.f32 %v1193_v43 }
 0x19c   :  { %v1245_v28 = vpop.eup %1244 }
 0x19d   :  { %v1195_v30 = vmul.f32 0.6931472, %v1245_v28 }
 0x19f   :  { %v1196_v45 = vsub.f32 %v1188_v15, %v1195_v30 }
 0x1a1   :  { %1201 = vrot.lane.b32.xlu0 %v1196_v45, %s1380_s4 }
 0x213   :  { %v1202_v34 = vpop.permute.xlu0 %1201 }
 0x214   :  { %v1203_v44 = vsel %vm1199_vm2, %v1200_v22, %v1202_v34 }
 0x215   :  { %1204 = vst [vmem:[#allocation10] sm:$0xff] %v1203_v44 }
 0x216   :  { %1215 = dma.vmem_to_hbm [thread:$0]  %s1211_s14, 128, %s1213_s17, [#allocation4]  }
 0x217   :  { %1372 = dma.done.wait [#allocation4], 128  }
 0x218   :  { %1373 = vsyncadd [#allocation4], 4294967168 }
 0x219   :  { %1220 = vsyncpa [#allocation3], 1 }
 0x21a   :  { %1221 = vsyncpa [#allocation6], 1 }
 0x21b   :  { %1222 = vsyncpa [#allocation9], 1 }
 0x21c   :  { %1223 = vsyncpa [#allocation4], 1 }

</bundles_post_ra>
